<compile_context>
chip_gen: v7x
topology: tpu7x:2x2x1
jax: 0.10.0
libtpu: 0.0.40
codegen_flags: <defaults>
</compile_context>

<pallas_src>
import functools

import jax
import jax.numpy as jnp
from jax import lax
from jax.experimental import pallas as pl
from jax.experimental.pallas import tpu as pltpu

NEG = -1e30  # "-inf" stand-in that stays finite through bf16 casts / matmuls


# ----------------------------------------------------------------------------- kernel
def _pnet_kernel(col1_ref, mask_ref,
                 w1_ref, b1_ref, a1_ref,
                 w2_ref, b2_ref, a2_ref,
                 w3_ref, b3_ref, a3_ref,
                 w4_ref, b4_ref,
                 out_ref, *, NPAD, poolW, W2w, W3w):
    f32, bf16 = jnp.float32, jnp.bfloat16

    # conv1 (im2col columns precomputed in the wrapper) + bias + prelu1
    h1 = jnp.dot(w1_ref[...], col1_ref[...], preferred_element_type=f32) + b1_ref[...]
    h1 = jnp.where(h1 > 0, h1, a1_ref[...] * h1)
    h1 = h1 + mask_ref[...]          # NEG at window slots outside conv1's output

    # MaxPool2d((2,5), ceil_mode=True): the 10 window slots of every pooled cell
    # are laid out as 10 contiguous, 128-aligned lane groups -> 9 vector maxes.
    pooled = h1[:, 0:NPAD]
    for s in range(1, 10):
        pooled = jnp.maximum(pooled, h1[:, s * NPAD:(s + 1) * NPAD])
    pooled = pooled.astype(bf16)     # cast once, before building im2col taps

    def conv3x5(act_bf, w_ref, b_ref, width):
        # VALID 3x5 conv over the flat (row stride = poolW) geometry as one matmul
        taps = [act_bf[:, i * poolW + j: i * poolW + j + width]
                for i in range(3) for j in range(5)]
        col = jnp.concatenate(taps, axis=0)                      # (15*C, width)
        return jnp.dot(w_ref[...], col, preferred_element_type=f32) + b_ref[...]

    # conv2 + prelu2, conv3 + prelu3
    h2 = conv3x5(pooled, w2_ref, b2_ref, W2w)
    h2 = jnp.where(h2 > 0, h2, a2_ref[...] * h2).astype(bf16)
    h3 = conv3x5(h2, w3_ref, b3_ref, W3w)
    h3 = jnp.where(h3 > 0, h3, a3_ref[...] * h3).astype(bf16)

    # fused 1x1 heads: rows 0:2 face logits (softmax), rows 2:6 bbox, 6:8 pad
    head = jnp.dot(w4_ref[...], h3, preferred_element_type=f32) + b4_ref[...]
    logits = head[0:2, :]
    m = jnp.max(logits, axis=0, keepdims=True)
    e = jnp.exp(logits - m)
    s = jnp.sum(e, axis=0, keepdims=True)
    prob = e * pl.reciprocal(s, approx=True)

    out = jnp.concatenate([prob, head[2:8, :]], axis=0)          # (8, W3w)
    out = jnp.concatenate([out, jnp.zeros((8, NPAD - W3w), f32)], axis=1)
    out_ref[...] = out                                           # single lane-dense store


# ----------------------------------------------------------------------------- wrapper
def pnet_forward(x, params, block_b=None):
    """x: (B, 3, H, W) float32 NCHW.  Returns (bbox, probs) in NCHW like PyTorch."""
    (w1, b1, al1, w2, b2, al2, w3, b3, al3, w41, b41, w42, b42) = params
    B, Cin, H, W = x.shape
    f32, bf16 = jnp.float32, jnp.bfloat16
    assert Cin == 3

    # static geometry -----------------------------------------------------------------
    H1, W1 = H - 2, W - 2                      # after conv1 (3x3, VALID)
    poolH, poolW = -(-H1 // 2), -(-W1 // 5)    # ceil-mode pool output
    H2, W2 = poolH - 2, poolW - 4              # after conv2 (3x5)
    H3, W3 = H2 - 2, W2 - 4                    # after conv3 (3x5)
    assert H3 >= 1 and W3 >= 1, "input too small for PNet"
    PP = poolH * poolW

    # batch blocking: fold block_b images into the lane axis of every matmul; keep
    # >= 2 grid steps when possible so both v7x TensorCores are used.
    if block_b is None:
        block_b = max(1, min(32, -(-B // 2)))
    nblocks = -(-B // block_b)
    Bp = nblocks * block_b

    NPP = block_b * PP                         # pooled cells per grid step
    NPAD = -(-NPP // 128) * 128                # lane-aligned pooled slab width
    L1 = 10 * NPAD                             # conv1-output slab width (10 window slots)
    W2w = NPAD - (2 * poolW + 4)               # conv2 output / tap width
    W3w = W2w - (2 * poolW + 4)                # conv3 output / head width
    K1, K1P = 27, 32                           # conv1 im2col depth (padded to 32)

    # weights: one-time im2col packing (tap-major, channel-minor), bf16 ----------------
    def im2col_w(w, cin_pad, cout_pad):
        co, ci, kh, kw = w.shape
        wp = jnp.pad(w, ((0, cout_pad - co), (0, cin_pad - ci), (0, 0), (0, 0)))
        return jnp.transpose(wp, (0, 2, 3, 1)).reshape(cout_pad, kh * kw * cin_pad)

    def colvec(v, pad):
        return jnp.pad(v.reshape(-1, 1), ((0, pad - v.shape[0]), (0, 0))).astype(f32)

    w1c = jnp.pad(im2col_w(w1, 3, 16), ((0, 0), (0, K1P - K1))).astype(bf16)   # (16, 32)
    w2c = im2col_w(w2, 16, 16).astype(bf16)                                    # (16, 240)
    w3c = im2col_w(w3, 16, 32).astype(bf16)                                    # (32, 240)
    w4c = jnp.pad(jnp.concatenate([w41.reshape(2, -1), w42.reshape(4, -1)], axis=0),
                  ((0, 2), (0, 0))).astype(bf16)                               # (8, 32)
    b1c, a1c = colvec(b1, 16), colvec(al1, 16)
    b2c, a2c = colvec(b2, 16), colvec(al2, 16)
    b3c, a3c = colvec(b3, 32), colvec(al3, 32)
    b4c = jnp.pad(jnp.concatenate([b41, b42]).reshape(-1, 1), ((0, 2), (0, 0))).astype(f32)

    # conv1 im2col, hoisted out of the kernel: column n = slot*NPAD + cell, where
    # cell = (img_in_block, pool_y, pool_x) and slot = (row-in-pair, col-in-window).
    Hp, Wp = 2 * poolH + 2, 5 * poolW + 2
    xp = jnp.pad(x.astype(f32), ((0, Bp - B), (0, 0), (0, Hp - H), (0, Wp - W)))
    taps = [xp[:, :, ti:ti + 2 * poolH, tj:tj + 5 * poolW]
            for ti in range(3) for tj in range(3)]
    col = jnp.stack(taps, axis=1).reshape(Bp, K1, poolH, 2, poolW, 5)
    col = col.reshape(nblocks, block_b, K1, poolH, 2, poolW, 5)
    col = jnp.transpose(col, (0, 2, 4, 6, 1, 3, 5))     # (nb, K1, 2, 5, blk, poolH, poolW)
    col = col.reshape(nblocks, K1, 10, NPP)
    col = jnp.pad(col, ((0, 0), (0, K1P - K1), (0, 0), (0, NPAD - NPP)))
    col1 = col.reshape(nblocks, K1P, L1).astype(bf16)

    # additive NEG mask marking pool-window slots that fall outside conv1's output
    cell = jnp.arange(NPAD)
    yy = (cell % PP) // poolW
    xx = (cell % PP) % poolW
    s10 = jnp.arange(10)
    row = 2 * yy[None, :] + (s10 // 5)[:, None]
    colx = 5 * xx[None, :] + (s10 % 5)[:, None]
    invalid = ((row >= H1) | (colx >= W1)) & (cell[None, :] < NPP)
    mask = jnp.where(invalid, NEG, 0.0).astype(f32).reshape(1, L1)

    kernel = functools.partial(_pnet_kernel, NPAD=NPAD, poolW=poolW, W2w=W2w, W3w=W3w)

    def resident(arr):
        nd = arr.ndim
        return pl.BlockSpec(arr.shape, lambda g, _nd=nd: (0,) * _nd)

    out = pl.pallas_call(
        kernel,
        out_shape=jax.ShapeDtypeStruct((nblocks, 8, NPAD), f32),
        grid=(nblocks,),
        in_specs=[pl.BlockSpec((None, K1P, L1), lambda g: (g, 0, 0)),
                  resident(mask),
                  resident(w1c), resident(b1c), resident(a1c),
                  resident(w2c), resident(b2c), resident(a2c),
                  resident(w3c), resident(b3c), resident(a3c),
                  resident(w4c), resident(b4c)],
        out_specs=pl.BlockSpec((None, 8, NPAD), lambda g: (g, 0, 0)),
        compiler_params=pltpu.CompilerParams(dimension_semantics=("parallel",)),
    )(col1, mask, w1c, b1c, a1c, w2c, b2c, a2c, w3c, b3c, a3c, w4c, b4c)

    # (nblocks, 8, NPAD) -> (B, 6, H3, W3); per-image head lives at lane stride PP
    out = out[:, :6, :NPP].reshape(nblocks, 6, block_b, PP)
    out = jnp.transpose(out, (0, 2, 1, 3)).reshape(Bp, 6, PP)[:B]
    out = out.reshape(B, 6, poolH, poolW)[:, :, :H3, :W3]
    a = out[:, 0:2]                                     # face probabilities (softmaxed)
    b = out[:, 2:6]                                     # bbox regression
    return b, a


# ----------------------------------------------------------------------------- params / reference
def init_params(key):
    ks = jax.random.split(key, 10)
    s = 0.1
    w1 = s * jax.random.normal(ks[0], (10, 3, 3, 3), jnp.float32)   # OIHW (PyTorch layout)
    b1 = s * jax.random.normal(ks[1], (10,), jnp.float32)
    al1 = jnp.full((10,), 0.25, jnp.float32)                        # PReLU default init
    w2 = s * jax.random.normal(ks[2], (16, 10, 3, 5), jnp.float32)
    b2 = s * jax.random.normal(ks[3], (16,), jnp.float32)
    al2 = jnp.full((16,), 0.25, jnp.float32)
    w3 = s * jax.random.normal(ks[4], (32, 16, 3, 5), jnp.float32)
    b3 = s * jax.random.normal(ks[5], (32,), jnp.float32)
    al3 = jnp.full((32,), 0.25, jnp.float32)
    w41 = s * jax.random.normal(ks[6], (2, 32, 1, 1), jnp.float32)
    b41 = s * jax.random.normal(ks[7], (2,), jnp.float32)
    w42 = s * jax.random.normal(ks[8], (4, 32, 1, 1), jnp.float32)
    b42 = s * jax.random.normal(ks[9], (4,), jnp.float32)
    return (w1, b1, al1, w2, b2, al2, w3, b3, al3, w41, b41, w42, b42)


def pnet_reference(x, params):
    """Pure-JAX reference mirroring the PyTorch module (NCHW, f32)."""
    (w1, b1, al1, w2, b2, al2, w3, b3, al3, w41, b41, w42, b42) = params

    def conv(y, w, b):
        y = lax.conv_general_dilated(y, w, (1, 1), 'VALID',
                                     dimension_numbers=('NCHW', 'OIHW', 'NCHW'),
                                     precision=lax.Precision.HIGHEST)
        return y + b.reshape(1, -1, 1, 1)

    def prelu(y, a):
        return jnp.where(y > 0, y, a.reshape(1, -1, 1, 1) * y)

    def maxpool_ceil(y, kh, kw):
        _, _, H, W = y.shape
        oH, oW = -(-H // kh), -(-W // kw)
        return lax.reduce_window(y, -jnp.inf, lax.max,
                                 (1, 1, kh, kw), (1, 1, kh, kw),
                                 ((0, 0), (0, 0), (0, oH * kh - H), (0, oW * kw - W)))

    h = prelu(conv(x, w1, b1), al1)
    h = maxpool_ceil(h, 2, 5)
    h = prelu(conv(h, w2, b2), al2)
    h = prelu(conv(h, w3, b3), al3)
    a = conv(h, w41, b41)
    b = conv(h, w42, b42)
    a = jax.nn.softmax(a, axis=1)
    return b, a


if __name__ == "__main__":
    key = jax.random.PRNGKey(0)
    kx, kp = jax.random.split(key)
    # input [batch, 3, h, w]; (2, 3, 16, 48) -> bbox (2, 4, 3, 2), probs (2, 2, 3, 2)
    x = jax.random.normal(kx, (2, 3, 16, 48), jnp.float32)
    params = init_params(kp)

    b_out, a_out = jax.jit(pnet_forward)(x, params)
    jax.block_until_ready((b_out, a_out))

    assert b_out.shape == (2, 4, 3, 2) and a_out.shape == (2, 2, 3, 2)
    b_ref, a_ref = pnet_reference(x, params)
    ok = (jnp.allclose(b_out, b_ref, atol=3e-2, rtol=3e-2) and
          jnp.allclose(a_out, a_ref, atol=3e-2, rtol=3e-2))
    if not bool(ok):
        raise AssertionError("Pallas PNet output mismatch vs JAX reference")
    print("KERNEL_OK")
</pallas_src>

<mosaic_0001>
module attributes {stable_mosaic.version = 11 : i64} {
  func.func @_pnet_kernel(%arg0: i32, %arg1: memref<1x32x1280xbf16, #tpu.memory_space<vmem>>, %arg2: memref<1x1280xf32, #tpu.memory_space<vmem>>, %arg3: memref<16x32xbf16, #tpu.memory_space<vmem>>, %arg4: memref<16x1xf32, #tpu.memory_space<vmem>>, %arg5: memref<16x1xf32, #tpu.memory_space<vmem>>, %arg6: memref<16x240xbf16, #tpu.memory_space<vmem>>, %arg7: memref<16x1xf32, #tpu.memory_space<vmem>>, %arg8: memref<16x1xf32, #tpu.memory_space<vmem>>, %arg9: memref<32x240xbf16, #tpu.memory_space<vmem>>, %arg10: memref<32x1xf32, #tpu.memory_space<vmem>>, %arg11: memref<32x1xf32, #tpu.memory_space<vmem>>, %arg12: memref<8x32xbf16, #tpu.memory_space<vmem>>, %arg13: memref<8x1xf32, #tpu.memory_space<vmem>>, %arg14: memref<1x8x128xf32, #tpu.memory_space<vmem>>) attributes {dimension_semantics = [#tpu.dimension_semantics<parallel>], iteration_bounds = array<i64: 2>, scalar_prefetch = 0 : i64, scratch_operands = 0 : i64, tpu.core_type = #tpu.core_type<tc>, window_params = [{transform_indices = @transform_0, window_bounds = array<i64: 1, 32, 1280>}, {pipeline_mode = #tpu.pipeline_mode<synchronous>, transform_indices = @transform_1, window_bounds = array<i64: 1, 1280>}, {pipeline_mode = #tpu.pipeline_mode<synchronous>, transform_indices = @transform_2, window_bounds = array<i64: 16, 32>}, {pipeline_mode = #tpu.pipeline_mode<synchronous>, transform_indices = @transform_3, window_bounds = array<i64: 16, 1>}, {pipeline_mode = #tpu.pipeline_mode<synchronous>, transform_indices = @transform_4, window_bounds = array<i64: 16, 1>}, {pipeline_mode = #tpu.pipeline_mode<synchronous>, transform_indices = @transform_5, window_bounds = array<i64: 16, 240>}, {pipeline_mode = #tpu.pipeline_mode<synchronous>, transform_indices = @transform_6, window_bounds = array<i64: 16, 1>}, {pipeline_mode = #tpu.pipeline_mode<synchronous>, transform_indices = @transform_7, window_bounds = array<i64: 16, 1>}, {pipeline_mode = #tpu.pipeline_mode<synchronous>, transform_indices = @transform_8, window_bounds = array<i64: 32, 240>}, {pipeline_mode = #tpu.pipeline_mode<synchronous>, transform_indices = @transform_9, window_bounds = array<i64: 32, 1>}, {pipeline_mode = #tpu.pipeline_mode<synchronous>, transform_indices = @transform_10, window_bounds = array<i64: 32, 1>}, {pipeline_mode = #tpu.pipeline_mode<synchronous>, transform_indices = @transform_11, window_bounds = array<i64: 8, 32>}, {pipeline_mode = #tpu.pipeline_mode<synchronous>, transform_indices = @transform_12, window_bounds = array<i64: 8, 1>}, {transform_indices = @transform_13, window_bounds = array<i64: 1, 8, 128>}]} {
    %c0 = arith.constant 0 : index
    %c0_0 = arith.constant 0 : index
    %0 = vector.load %arg3[%c0, %c0_0] : memref<16x32xbf16, #tpu.memory_space<vmem>>, vector<16x32xbf16>
    %c0_1 = arith.constant 0 : index
    %c0_2 = arith.constant 0 : index
    %c0_3 = arith.constant 0 : index
    %1 = vector.load %arg1[%c0_1, %c0_2, %c0_3] : memref<1x32x1280xbf16, #tpu.memory_space<vmem>>, vector<1x32x1280xbf16>
    %2 = vector.shape_cast %1 : vector<1x32x1280xbf16> to vector<32x1280xbf16>
    %cst = arith.constant dense<0.000000e+00> : vector<16x1280xf32>
    %3 = tpu.matmul %0, %2, %cst {dimension_numbers = #tpu.dot_dimension_numbers<[1], [0], [0], [1], [0, 0, 1, 1], [], []>} : vector<16x32xbf16>, vector<32x1280xbf16>, vector<16x1280xf32> -> vector<16x1280xf32>
    %c0_4 = arith.constant 0 : index
    %c0_5 = arith.constant 0 : index
    %4 = vector.load %arg4[%c0_4, %c0_5] : memref<16x1xf32, #tpu.memory_space<vmem>>, vector<16x1xf32>
    %5 = vector.broadcast %4 : vector<16x1xf32> to vector<16x1280xf32>
    %6 = arith.addf %3, %5 : vector<16x1280xf32>
    %cst_6 = arith.constant 0.000000e+00 : f32
    %7 = vector.broadcast %cst_6 : f32 to vector<16x1280xf32>
    %8 = arith.cmpf ogt, %6, %7 : vector<16x1280xf32>
    %c0_7 = arith.constant 0 : index
    %c0_8 = arith.constant 0 : index
    %9 = vector.load %arg5[%c0_7, %c0_8] : memref<16x1xf32, #tpu.memory_space<vmem>>, vector<16x1xf32>
    %10 = vector.broadcast %9 : vector<16x1xf32> to vector<16x1280xf32>
    %11 = arith.mulf %10, %6 : vector<16x1280xf32>
    %12 = arith.select %8, %6, %11 : vector<16x1280xi1>, vector<16x1280xf32>
    %c0_9 = arith.constant 0 : index
    %c0_10 = arith.constant 0 : index
    %13 = vector.load %arg2[%c0_9, %c0_10] : memref<1x1280xf32, #tpu.memory_space<vmem>>, vector<1x1280xf32>
    %14 = vector.broadcast %13 : vector<1x1280xf32> to vector<16x1280xf32>
    %15 = arith.addf %12, %14 : vector<16x1280xf32>
    %16 = vector.extract_strided_slice %15 {offsets = [0, 0], sizes = [16, 128], strides = [1, 1]} : vector<16x1280xf32> to vector<16x128xf32>
    %17 = vector.extract_strided_slice %15 {offsets = [0, 128], sizes = [16, 128], strides = [1, 1]} : vector<16x1280xf32> to vector<16x128xf32>
    %18 = arith.maximumf %16, %17 : vector<16x128xf32>
    %19 = vector.extract_strided_slice %15 {offsets = [0, 256], sizes = [16, 128], strides = [1, 1]} : vector<16x1280xf32> to vector<16x128xf32>
    %20 = arith.maximumf %18, %19 : vector<16x128xf32>
    %21 = vector.extract_strided_slice %15 {offsets = [0, 384], sizes = [16, 128], strides = [1, 1]} : vector<16x1280xf32> to vector<16x128xf32>
    %22 = arith.maximumf %20, %21 : vector<16x128xf32>
    %23 = vector.extract_strided_slice %15 {offsets = [0, 512], sizes = [16, 128], strides = [1, 1]} : vector<16x1280xf32> to vector<16x128xf32>
    %24 = arith.maximumf %22, %23 : vector<16x128xf32>
    %25 = vector.extract_strided_slice %15 {offsets = [0, 640], sizes = [16, 128], strides = [1, 1]} : vector<16x1280xf32> to vector<16x128xf32>
    %26 = arith.maximumf %24, %25 : vector<16x128xf32>
    %27 = vector.extract_strided_slice %15 {offsets = [0, 768], sizes = [16, 128], strides = [1, 1]} : vector<16x1280xf32> to vector<16x128xf32>
    %28 = arith.maximumf %26, %27 : vector<16x128xf32>
    %29 = vector.extract_strided_slice %15 {offsets = [0, 896], sizes = [16, 128], strides = [1, 1]} : vector<16x1280xf32> to vector<16x128xf32>
    %30 = arith.maximumf %28, %29 : vector<16x128xf32>
    %31 = vector.extract_strided_slice %15 {offsets = [0, 1024], sizes = [16, 128], strides = [1, 1]} : vector<16x1280xf32> to vector<16x128xf32>
    %32 = arith.maximumf %30, %31 : vector<16x128xf32>
    %33 = vector.extract_strided_slice %15 {offsets = [0, 1152], sizes = [16, 128], strides = [1, 1]} : vector<16x1280xf32> to vector<16x128xf32>
    %34 = arith.maximumf %32, %33 : vector<16x128xf32>
    %35 = arith.truncf %34 : vector<16x128xf32> to vector<16x128xbf16>
    %36 = vector.extract_strided_slice %35 {offsets = [0, 0], sizes = [16, 104], strides = [1, 1]} : vector<16x128xbf16> to vector<16x104xbf16>
    %37 = vector.extract_strided_slice %35 {offsets = [0, 1], sizes = [16, 104], strides = [1, 1]} : vector<16x128xbf16> to vector<16x104xbf16>
    %38 = vector.extract_strided_slice %35 {offsets = [0, 2], sizes = [16, 104], strides = [1, 1]} : vector<16x128xbf16> to vector<16x104xbf16>
    %39 = vector.extract_strided_slice %35 {offsets = [0, 3], sizes = [16, 104], strides = [1, 1]} : vector<16x128xbf16> to vector<16x104xbf16>
    %40 = vector.extract_strided_slice %35 {offsets = [0, 4], sizes = [16, 104], strides = [1, 1]} : vector<16x128xbf16> to vector<16x104xbf16>
    %41 = vector.extract_strided_slice %35 {offsets = [0, 10], sizes = [16, 104], strides = [1, 1]} : vector<16x128xbf16> to vector<16x104xbf16>
    %42 = vector.extract_strided_slice %35 {offsets = [0, 11], sizes = [16, 104], strides = [1, 1]} : vector<16x128xbf16> to vector<16x104xbf16>
    %43 = vector.extract_strided_slice %35 {offsets = [0, 12], sizes = [16, 104], strides = [1, 1]} : vector<16x128xbf16> to vector<16x104xbf16>
    %44 = vector.extract_strided_slice %35 {offsets = [0, 13], sizes = [16, 104], strides = [1, 1]} : vector<16x128xbf16> to vector<16x104xbf16>
    %45 = vector.extract_strided_slice %35 {offsets = [0, 14], sizes = [16, 104], strides = [1, 1]} : vector<16x128xbf16> to vector<16x104xbf16>
    %46 = vector.extract_strided_slice %35 {offsets = [0, 20], sizes = [16, 104], strides = [1, 1]} : vector<16x128xbf16> to vector<16x104xbf16>
    %47 = vector.extract_strided_slice %35 {offsets = [0, 21], sizes = [16, 104], strides = [1, 1]} : vector<16x128xbf16> to vector<16x104xbf16>
    %48 = vector.extract_strided_slice %35 {offsets = [0, 22], sizes = [16, 104], strides = [1, 1]} : vector<16x128xbf16> to vector<16x104xbf16>
    %49 = vector.extract_strided_slice %35 {offsets = [0, 23], sizes = [16, 104], strides = [1, 1]} : vector<16x128xbf16> to vector<16x104xbf16>
    %50 = vector.extract_strided_slice %35 {offsets = [0, 24], sizes = [16, 104], strides = [1, 1]} : vector<16x128xbf16> to vector<16x104xbf16>
    %51 = tpu.concatenate %36, %37, %38, %39, %40, %41, %42, %43, %44, %45, %46, %47, %48, %49, %50 in 0 : vector<16x104xbf16>, vector<16x104xbf16>, vector<16x104xbf16>, vector<16x104xbf16>, vector<16x104xbf16>, vector<16x104xbf16>, vector<16x104xbf16>, vector<16x104xbf16>, vector<16x104xbf16>, vector<16x104xbf16>, vector<16x104xbf16>, vector<16x104xbf16>, vector<16x104xbf16>, vector<16x104xbf16>, vector<16x104xbf16> -> vector<240x104xbf16>
    %c0_11 = arith.constant 0 : index
    %c0_12 = arith.constant 0 : index
    %52 = vector.load %arg6[%c0_11, %c0_12] : memref<16x240xbf16, #tpu.memory_space<vmem>>, vector<16x240xbf16>
    %cst_13 = arith.constant dense<0.000000e+00> : vector<16x104xf32>
    %53 = tpu.matmul %52, %51, %cst_13 {dimension_numbers = #tpu.dot_dimension_numbers<[1], [0], [0], [1], [0, 0, 1, 1], [], []>} : vector<16x240xbf16>, vector<240x104xbf16>, vector<16x104xf32> -> vector<16x104xf32>
    %c0_14 = arith.constant 0 : index
    %c0_15 = arith.constant 0 : index
    %54 = vector.load %arg7[%c0_14, %c0_15] : memref<16x1xf32, #tpu.memory_space<vmem>>, vector<16x1xf32>
    %55 = vector.broadcast %54 : vector<16x1xf32> to vector<16x104xf32>
    %56 = arith.addf %53, %55 : vector<16x104xf32>
    %cst_16 = arith.constant 0.000000e+00 : f32
    %57 = vector.broadcast %cst_16 : f32 to vector<16x104xf32>
    %58 = arith.cmpf ogt, %56, %57 : vector<16x104xf32>
    %c0_17 = arith.constant 0 : index
    %c0_18 = arith.constant 0 : index
    %59 = vector.load %arg8[%c0_17, %c0_18] : memref<16x1xf32, #tpu.memory_space<vmem>>, vector<16x1xf32>
    %60 = vector.broadcast %59 : vector<16x1xf32> to vector<16x104xf32>
    %61 = arith.mulf %60, %56 : vector<16x104xf32>
    %62 = arith.select %58, %56, %61 : vector<16x104xi1>, vector<16x104xf32>
    %63 = arith.truncf %62 : vector<16x104xf32> to vector<16x104xbf16>
    %64 = vector.extract_strided_slice %63 {offsets = [0, 0], sizes = [16, 80], strides = [1, 1]} : vector<16x104xbf16> to vector<16x80xbf16>
    %65 = vector.extract_strided_slice %63 {offsets = [0, 1], sizes = [16, 80], strides = [1, 1]} : vector<16x104xbf16> to vector<16x80xbf16>
    %66 = vector.extract_strided_slice %63 {offsets = [0, 2], sizes = [16, 80], strides = [1, 1]} : vector<16x104xbf16> to vector<16x80xbf16>
    %67 = vector.extract_strided_slice %63 {offsets = [0, 3], sizes = [16, 80], strides = [1, 1]} : vector<16x104xbf16> to vector<16x80xbf16>
    %68 = vector.extract_strided_slice %63 {offsets = [0, 4], sizes = [16, 80], strides = [1, 1]} : vector<16x104xbf16> to vector<16x80xbf16>
    %69 = vector.extract_strided_slice %63 {offsets = [0, 10], sizes = [16, 80], strides = [1, 1]} : vector<16x104xbf16> to vector<16x80xbf16>
    %70 = vector.extract_strided_slice %63 {offsets = [0, 11], sizes = [16, 80], strides = [1, 1]} : vector<16x104xbf16> to vector<16x80xbf16>
    %71 = vector.extract_strided_slice %63 {offsets = [0, 12], sizes = [16, 80], strides = [1, 1]} : vector<16x104xbf16> to vector<16x80xbf16>
    %72 = vector.extract_strided_slice %63 {offsets = [0, 13], sizes = [16, 80], strides = [1, 1]} : vector<16x104xbf16> to vector<16x80xbf16>
    %73 = vector.extract_strided_slice %63 {offsets = [0, 14], sizes = [16, 80], strides = [1, 1]} : vector<16x104xbf16> to vector<16x80xbf16>
    %74 = vector.extract_strided_slice %63 {offsets = [0, 20], sizes = [16, 80], strides = [1, 1]} : vector<16x104xbf16> to vector<16x80xbf16>
    %75 = vector.extract_strided_slice %63 {offsets = [0, 21], sizes = [16, 80], strides = [1, 1]} : vector<16x104xbf16> to vector<16x80xbf16>
    %76 = vector.extract_strided_slice %63 {offsets = [0, 22], sizes = [16, 80], strides = [1, 1]} : vector<16x104xbf16> to vector<16x80xbf16>
    %77 = vector.extract_strided_slice %63 {offsets = [0, 23], sizes = [16, 80], strides = [1, 1]} : vector<16x104xbf16> to vector<16x80xbf16>
    %78 = vector.extract_strided_slice %63 {offsets = [0, 24], sizes = [16, 80], strides = [1, 1]} : vector<16x104xbf16> to vector<16x80xbf16>
    %79 = tpu.concatenate %64, %65, %66, %67, %68, %69, %70, %71, %72, %73, %74, %75, %76, %77, %78 in 0 : vector<16x80xbf16>, vector<16x80xbf16>, vector<16x80xbf16>, vector<16x80xbf16>, vector<16x80xbf16>, vector<16x80xbf16>, vector<16x80xbf16>, vector<16x80xbf16>, vector<16x80xbf16>, vector<16x80xbf16>, vector<16x80xbf16>, vector<16x80xbf16>, vector<16x80xbf16>, vector<16x80xbf16>, vector<16x80xbf16> -> vector<240x80xbf16>
    %c0_19 = arith.constant 0 : index
    %c0_20 = arith.constant 0 : index
    %80 = vector.load %arg9[%c0_19, %c0_20] : memref<32x240xbf16, #tpu.memory_space<vmem>>, vector<32x240xbf16>
    %cst_21 = arith.constant dense<0.000000e+00> : vector<32x80xf32>
    %81 = tpu.matmul %80, %79, %cst_21 {dimension_numbers = #tpu.dot_dimension_numbers<[1], [0], [0], [1], [0, 0, 1, 1], [], []>} : vector<32x240xbf16>, vector<240x80xbf16>, vector<32x80xf32> -> vector<32x80xf32>
    %c0_22 = arith.constant 0 : index
    %c0_23 = arith.constant 0 : index
    %82 = vector.load %arg10[%c0_22, %c0_23] : memref<32x1xf32, #tpu.memory_space<vmem>>, vector<32x1xf32>
    %83 = vector.broadcast %82 : vector<32x1xf32> to vector<32x80xf32>
    %84 = arith.addf %81, %83 : vector<32x80xf32>
    %cst_24 = arith.constant 0.000000e+00 : f32
    %85 = vector.broadcast %cst_24 : f32 to vector<32x80xf32>
    %86 = arith.cmpf ogt, %84, %85 : vector<32x80xf32>
    %c0_25 = arith.constant 0 : index
    %c0_26 = arith.constant 0 : index
    %87 = vector.load %arg11[%c0_25, %c0_26] : memref<32x1xf32, #tpu.memory_space<vmem>>, vector<32x1xf32>
    %88 = vector.broadcast %87 : vector<32x1xf32> to vector<32x80xf32>
    %89 = arith.mulf %88, %84 : vector<32x80xf32>
    %90 = arith.select %86, %84, %89 : vector<32x80xi1>, vector<32x80xf32>
    %91 = arith.truncf %90 : vector<32x80xf32> to vector<32x80xbf16>
    %c0_27 = arith.constant 0 : index
    %c0_28 = arith.constant 0 : index
    %92 = vector.load %arg12[%c0_27, %c0_28] : memref<8x32xbf16, #tpu.memory_space<vmem>>, vector<8x32xbf16>
    %cst_29 = arith.constant dense<0.000000e+00> : vector<8x80xf32>
    %93 = tpu.matmul %92, %91, %cst_29 {dimension_numbers = #tpu.dot_dimension_numbers<[1], [0], [0], [1], [0, 0, 1, 1], [], []>} : vector<8x32xbf16>, vector<32x80xbf16>, vector<8x80xf32> -> vector<8x80xf32>
    %c0_30 = arith.constant 0 : index
    %c0_31 = arith.constant 0 : index
    %94 = vector.load %arg13[%c0_30, %c0_31] : memref<8x1xf32, #tpu.memory_space<vmem>>, vector<8x1xf32>
    %95 = vector.broadcast %94 : vector<8x1xf32> to vector<8x80xf32>
    %96 = arith.addf %93, %95 : vector<8x80xf32>
    %97 = vector.extract_strided_slice %96 {offsets = [0, 0], sizes = [2, 80], strides = [1, 1]} : vector<8x80xf32> to vector<2x80xf32>
    %cst_32 = arith.constant dense<0xFF800000> : vector<80xf32>
    %98 = vector.multi_reduction <maximumf>, %97, %cst_32 [0] : vector<2x80xf32> to vector<80xf32>
    %99 = vector.shape_cast %98 : vector<80xf32> to vector<1x80xf32>
    %100 = vector.broadcast %99 : vector<1x80xf32> to vector<2x80xf32>
    %101 = arith.subf %97, %100 : vector<2x80xf32>
    %102 = math.exp %101 : vector<2x80xf32>
    %cst_33 = arith.constant dense<0.000000e+00> : vector<80xf32>
    %103 = vector.multi_reduction <add>, %102, %cst_33 [0] : vector<2x80xf32> to vector<80xf32>
    %104 = vector.shape_cast %103 : vector<80xf32> to vector<1x80xf32>
    %105 = tpu.reciprocal %104 {approx = true} : vector<1x80xf32> -> vector<1x80xf32>
    %106 = vector.broadcast %105 : vector<1x80xf32> to vector<2x80xf32>
    %107 = arith.mulf %102, %106 : vector<2x80xf32>
    %108 = vector.extract_strided_slice %96 {offsets = [2, 0], sizes = [6, 80], strides = [1, 1]} : vector<8x80xf32> to vector<6x80xf32>
    %109 = tpu.concatenate %107, %108 in 0 : vector<2x80xf32>, vector<6x80xf32> -> vector<8x80xf32>
    %cst_34 = arith.constant 0.000000e+00 : f32
    %110 = vector.broadcast %cst_34 : f32 to vector<8x48xf32>
    %111 = tpu.concatenate %109, %110 in 1 : vector<8x80xf32>, vector<8x48xf32> -> vector<8x128xf32>
    %c0_35 = arith.constant 0 : index
    %c0_36 = arith.constant 0 : index
    %c0_37 = arith.constant 0 : index
    %112 = vector.load %arg14[%c0_35, %c0_36, %c0_37] : memref<1x8x128xf32, #tpu.memory_space<vmem>>, vector<1x8x128xf32>
    %113 = vector.shape_cast %112 : vector<1x8x128xf32> to vector<8x128xf32>
    %114 = vector.shape_cast %111 : vector<8x128xf32> to vector<1x8x128xf32>
    tpu.vector_store %arg14[%c0_35, %c0_36, %c0_37], %114 {strides = array<i32>} : memref<1x8x128xf32, #tpu.memory_space<vmem>>, vector<1x8x128xf32>,
    return
  }
  func.func @transform_0(%arg0: i32) -> (i32, i32, i32) {
    %c0_i32 = arith.constant 0 : i32
    %c0_i32_0 = arith.constant 0 : i32
    %c0_i32_1 = arith.constant 0 : i32
    return %arg0, %c0_i32, %c0_i32_0 : i32, i32, i32
  }
  func.func @transform_1(%arg0: i32) -> (i32, i32) {
    %c0_i32 = arith.constant 0 : i32
    %c0_i32_0 = arith.constant 0 : i32
    %c0_i32_1 = arith.constant 0 : i32
    return %c0_i32, %c0_i32_0 : i32, i32
  }
  func.func @transform_2(%arg0: i32) -> (i32, i32) {
    %c0_i32 = arith.constant 0 : i32
    %c0_i32_0 = arith.constant 0 : i32
    %c0_i32_1 = arith.constant 0 : i32
    return %c0_i32, %c0_i32_0 : i32, i32
  }
  func.func @transform_3(%arg0: i32) -> (i32, i32) {
    %c0_i32 = arith.constant 0 : i32
    %c0_i32_0 = arith.constant 0 : i32
    %c0_i32_1 = arith.constant 0 : i32
    return %c0_i32, %c0_i32_0 : i32, i32
  }
  func.func @transform_4(%arg0: i32) -> (i32, i32) {
    %c0_i32 = arith.constant 0 : i32
    %c0_i32_0 = arith.constant 0 : i32
    %c0_i32_1 = arith.constant 0 : i32
    return %c0_i32, %c0_i32_0 : i32, i32
  }
  func.func @transform_5(%arg0: i32) -> (i32, i32) {
    %c0_i32 = arith.constant 0 : i32
    %c0_i32_0 = arith.constant 0 : i32
    %c0_i32_1 = arith.constant 0 : i32
    return %c0_i32, %c0_i32_0 : i32, i32
  }
  func.func @transform_6(%arg0: i32) -> (i32, i32) {
    %c0_i32 = arith.constant 0 : i32
    %c0_i32_0 = arith.constant 0 : i32
    %c0_i32_1 = arith.constant 0 : i32
    return %c0_i32, %c0_i32_0 : i32, i32
  }
  func.func @transform_7(%arg0: i32) -> (i32, i32) {
    %c0_i32 = arith.constant 0 : i32
    %c0_i32_0 = arith.constant 0 : i32
    %c0_i32_1 = arith.constant 0 : i32
    return %c0_i32, %c0_i32_0 : i32, i32
  }
  func.func @transform_8(%arg0: i32) -> (i32, i32) {
    %c0_i32 = arith.constant 0 : i32
    %c0_i32_0 = arith.constant 0 : i32
    %c0_i32_1 = arith.constant 0 : i32
    return %c0_i32, %c0_i32_0 : i32, i32
  }
  func.func @transform_9(%arg0: i32) -> (i32, i32) {
    %c0_i32 = arith.constant 0 : i32
    %c0_i32_0 = arith.constant 0 : i32
    %c0_i32_1 = arith.constant 0 : i32
    return %c0_i32, %c0_i32_0 : i32, i32
  }
  func.func @transform_10(%arg0: i32) -> (i32, i32) {
    %c0_i32 = arith.constant 0 : i32
    %c0_i32_0 = arith.constant 0 : i32
    %c0_i32_1 = arith.constant 0 : i32
    return %c0_i32, %c0_i32_0 : i32, i32
  }
  func.func @transform_11(%arg0: i32) -> (i32, i32) {
    %c0_i32 = arith.constant 0 : i32
    %c0_i32_0 = arith.constant 0 : i32
    %c0_i32_1 = arith.constant 0 : i32
    return %c0_i32, %c0_i32_0 : i32, i32
  }
  func.func @transform_12(%arg0: i32) -> (i32, i32) {
    %c0_i32 = arith.constant 0 : i32
    %c0_i32_0 = arith.constant 0 : i32
    %c0_i32_1 = arith.constant 0 : i32
    return %c0_i32, %c0_i32_0 : i32, i32
  }
  func.func @transform_13(%arg0: i32) -> (i32, i32, i32) {
    %c0_i32 = arith.constant 0 : i32
    %c0_i32_0 = arith.constant 0 : i32
    %c0_i32_1 = arith.constant 0 : i32
    return %arg0, %c0_i32, %c0_i32_0 : i32, i32, i32
  }
}

</mosaic_0001>

<bundles_post_ra>
// kernel: pnet_forward.1
= control target key start
LH: loop header
LB: loop body
LE: loop exit
PB: predicated region body
PF: predicated region fallthrough
CT: control target
= control target key end

     0   :  { %s1626_s25 = smov 0   ;;  %s1912_s0 = inlined_call_operand.vmem [shape: bf16[2,32,1280], index: 0, kind: input, shape index: {}]   ;;  %s1913_s1 = inlined_call_operand.vmem [shape: f32[1,1280], index: 1, kind: input, shape index: {}]   ;;  %s1914_s2 = inlined_call_operand.vmem [shape: bf16[16,32], index: 2, kind: input, shape index: {}]   ;;  %s1915_s3 = inlined_call_operand.vmem [shape: f32[16,1], index: 3, kind: input, shape index: {}]   ;;  %s1916_s4 = inlined_call_operand.vmem [shape: f32[16,1], index: 4, kind: input, shape index: {}]   ;;  %s1917_s5 = inlined_call_operand.vmem [shape: bf16[16,240], index: 5, kind: input, shape index: {}]   ;;  %s1918_s6 = inlined_call_operand.vmem [shape: f32[16,1], index: 6, kind: input, shape index: {}]   ;;  %s1919_s7 = inlined_call_operand.vmem [shape: f32[16,1], index: 7, kind: input, shape index: {}]   ;;  %s1920_s8 = inlined_call_operand.vmem [shape: bf16[32,240], index: 8, kind: input, shape index: {}]   ;;  %s1921_s9 = inlined_call_operand.vmem [shape: f32[32,1], index: 9, kind: input, shape index: {}]   ;;  %s1922_s10 = inlined_call_operand.vmem [shape: f32[32,1], index: 10, kind: input, shape index: {}]   ;;  %s1923_s11 = inlined_call_operand.vmem [shape: bf16[8,32], index: 11, kind: input, shape index: {}]   ;;  %s1924_s12 = inlined_call_operand.vmem [shape: f32[8,1], index: 12, kind: input, shape index: {}]   ;;  %s1925_s13 = inlined_call_operand.vmem [shape: f32[2,8,128], index: 13, kind: output, shape index: {}]  }
   0x1 LB: > { %s1403_s26 = sadd.s32 4294967295, %s1537_s25   ;;  %p1407_p0 = scmp.ge.s32.totalorder %s1537_s25, 1  ;;  %s1537_s25 = sphi %s1626_s25, %s23_s25  }
   0x2   : > { %p387_p1 = scmp.lt.s32.totalorder %s1537_s25, 3 }
   0x4   : > { %p388_p2 = pnand %p1407_p0, %p387_p1 }
   0x5   : > { %p430_p3 = scmp.lt.s32.totalorder (!%p388_p2), %s1403_s26, 1  ;;  %v1539_v0 = vmov (!%p388_p2), 0   ;;  %v462_v1 = vld [vmem:[%s1915_s3] sm:$0xff] (!%p388_p2)  ;;  %v463_v3 = vld [vmem:[%s1915_s3 + $0x8] sm:$0xff] (!%p388_p2)  ;;  %vm579_vm0 = vcmask (!%p388_p2), 261120   ;;  %v874_v26 = vlaneseq (!%p388_p2)  ;;  %s1540_s30 = smov (!%p388_p2), 126  }
   0x6   : > { %391 = sbr.rel (%p388_p2) target bundleno = 1340 (0x53c), region = 72  ;;  %615 = vmatprep.mubr.bf16.mxu0 (!%p388_p2), %v1539_v0  ;;  %658 = vmatprep.mubr.bf16.mxu1 (!%p388_p2), %v1539_v0  ;;  %v818_v2 = vld [vmem:[%s1916_s4] sm:$0xff] (!%p388_p2)  ;;  %v819_v4 = vld [vmem:[%s1916_s4 + $0x8] sm:$0xff] (!%p388_p2)  ;;  %s1541_s14 = smov (!%p388_p2), 127  }
   0x7   : > { %1485 = vset.pattern.permute.xlu0 (!%p388_p2), %v1539_v0  ;;  %1486 = vset.pattern.permute.xlu1 (!%p388_p2), %v1539_v0  ;;  %v1499_v13 = vld [vmem:[%s1914_s2] sm:$0xff] (!%p388_p2)   ;;  %v875_v27 = vshrl.u32 (!%p388_p2), %v874_v26, 7  ;;  %v871_v40 = vld [vmem:[%s1913_s1 + $0x8] sm:$0x3] (!%p388_p2)  ;;  %s1542_s15 = smov (!%p388_p2), 124   ;;  %s1544_s17 = smov (!%p388_p2), 117  }
   0x8   : > { %466 = vperm.xlu0 (!%p388_p2), %1485, %v462_v1   ;;  %822 = vperm.xlu1 (!%p388_p2), %1486, %v818_v2   ;;  %v870_v29 = vld [vmem:[%s1913_s1] sm:$0xff] (!%p388_p2)  ;;  %s1932_s18 = smov (!%p388_p2), 118   ;;  %s1928_s19 = smov (!%p388_p2), 115  }
   0x9   : > { %v876_v28 = vsub.s32 (!%p388_p2), 0, %v875_v27  ;;  %v884_v30 = vsub.s32 (!%p388_p2), 2, %v875_v27  ;;  %v880_v31 = vsub.s32 (!%p388_p2), 1, %v875_v27  ;;  %v888_v32 = vsub.s32 (!%p388_p2), 3, %v875_v27  ;;  %s1926_s20 = smov (!%p388_p2), 116   ;;  %s1930_s22 = smov (!%p388_p2), 114  }
   0xa   : > { %v892_v33 = vsub.s32 (!%p388_p2), 4, %v875_v27  ;;  %v900_v34 = vsub.s32 (!%p388_p2), 6, %v875_v27  ;;  %v896_v35 = vsub.s32 (!%p388_p2), 5, %v875_v27  ;;  %v904_v37 = vsub.s32 (!%p388_p2), 7, %v875_v27  ;;  %s1929_s23 = smov (!%p388_p2), 106   ;;  %s1931_s24 = smov (!%p388_p2), 107  }
   0xb   : > { %v877_v39 = vrot.slane (!%p388_p2), %v870_v29, %v876_v28  ;;  %v1701_v43 = vrot.slane (!%p388_p2), %v870_v29, %v884_v30  ;;  %v1703_v44 = vrot.slane (!%p388_p2), %v870_v29, %v880_v31  ;;  %v1705_v45 = vrot.slane (!%p388_p2), %v870_v29, %v888_v32  ;;  %s1934_s27 = smov (!%p388_p2), 104   ;;  %s1933_s28 = smov (!%p388_p2), 105  }
   0xc   : > { %471 = vperm.xlu0 (!%p388_p2), %1485, %v463_v3   ;;  %827 = vperm.xlu1 (!%p388_p2), %1486, %v819_v4   ;;  %v1707_v46 = vrot.slane (!%p388_p2), %v870_v29, %v892_v33  ;;  %v1711_v51 = vrot.slane (!%p388_p2), %v870_v29, %v900_v34  ;;  %v1713_v52 = vrot.slane (!%p388_p2), %v870_v29, %v896_v35 }
   0xd   : > { %s1945_s26 = smov (!%p430_p3, %s1403_s26), 1  ;;  %v1717_v57 = vrot.slane %v870_v29, %v904_v37  ;;  %v1719_v58 = vrot.slane %v871_v40, %v876_v28 }
   0xe   : > { %s1459_s16 = smul.u32 160, %s1945_s26 }
  0x10   : > { %s1656_s21 = scalar_lea.vmem %s1912_s0, %s1459_s16  ;;  %s1543_s16 = smov 125  }
  0x11   : > { %v1487_v5 = vld [vmem:[%s1656_s21 + $0x4] ss:$40 sps:$4 sm:$0xff]   ;;  %v1491_v7 = vld [vmem:[%s1656_s21] ss:$40 sps:$4 sm:$0xff]   ;;  %v1493_v9 = vld [vmem:[%s1656_s21 + $0x54] ss:$40 sps:$4 sm:$0xff]  }
  0x12   : > { %v1489_v6 = vld [vmem:[%s1656_s21 + $0xc] ss:$40 sps:$4 sm:$0xff]   ;;  %583 = vmatprep.subr.bf16.mxu0 %v1487_v5  ;;  %v1492_v8 = vld [vmem:[%s1656_s21 + $0x8] ss:$40 sps:$4 sm:$0xff]   ;;  %v1495_v10 = vld [vmem:[%s1656_s21 + $0x5c] ss:$40 sps:$4 sm:$0xff]  }
  0x13   : > { %626 = vmatprep.subr.bf16.mxu1 %v1489_v6  ;;  %584 = vmatpush1.bf16.msra.mxu0 %v1491_v7  ;;  %v1497_v11 = vld [vmem:[%s1656_s21 + $0x50] ss:$40 sps:$4 sm:$0xff]   ;;  %v1502_v14 = vld [vmem:[%s1656_s21 + $0x14] ss:$40 sps:$4 sm:$0xff]   ;;  %v1508_v18 = vld [vmem:[%s1656_s21 + $0x64] ss:$40 sps:$4 sm:$0xff]  }
  0x14   : > { %627 = vmatpush1.bf16.msra.mxu1 %v1492_v8  ;;  %585 = vmatprep.subr.bf16.mxu0 %v1493_v9  ;;  %v1498_v12 = vld [vmem:[%s1656_s21 + $0x58] ss:$40 sps:$4 sm:$0xff]   ;;  %v1505_v16 = vld [vmem:[%s1656_s21 + $0x1c] ss:$40 sps:$4 sm:$0xff]   ;;  %v1511_v19 = vld [vmem:[%s1656_s21 + $0x6c] ss:$40 sps:$4 sm:$0xff]  }
  0x15   : > { %628 = vmatprep.subr.bf16.mxu1 %v1495_v10  ;;  %v1500_v15 = vld [vmem:[%s1656_s21 + $0x10] ss:$40 sps:$4 sm:$0xff]   ;;  %v1506_v20 = vld [vmem:[%s1656_s21 + $0x60] ss:$40 sps:$4 sm:$0xff]   ;;  %v1514_v22 = vld [vmem:[%s1656_s21 + $0x24] ss:$40 sps:$4 sm:$0xff]  }
  0x16   : > { %v1503_v17 = vld [vmem:[%s1656_s21 + $0x18] ss:$40 sps:$4 sm:$0xff]   ;;  %v1509_v21 = vld [vmem:[%s1656_s21 + $0x68] ss:$40 sps:$4 sm:$0xff]   ;;  %v1517_v24 = vld [vmem:[%s1656_s21 + $0x74] ss:$40 sps:$4 sm:$0xff]  }
  0x17   : > { %586 = vmatpush1.bf16.msra.mxu0 %v1497_v11  ;;  %v1512_v23 = vld [vmem:[%s1656_s21 + $0x20] ss:$40 sps:$4 sm:$0xff]   ;;  %v1515_v25 = vld [vmem:[%s1656_s21 + $0x70] ss:$40 sps:$4 sm:$0xff]   ;;  %v1732_v11 = vrot.slane %v871_v40, %v880_v31  ;;  %s1927_s21 = smov 108  }
  0x18   : > { %629 = vmatpush1.bf16.msra.mxu1 %v1498_v12  ;;  %669 = vmatprep.subr.bf16.mxu0 %v1502_v14 }
  0x19   : > { %712 = vmatprep.subr.bf16.mxu1 %v1505_v16 }
  0x1a   : > { %1431 = vmatmul.mubr.msk.bf16.vlgmr.msra.gmra.mrb[0].mxu0 %vm579_vm0, %v1499_v13 }
  0x1b   : > { %1432 = vmatmul.mubr.msk.bf16.vlgmr.msra.gmra.mrb[0].mxu1 %vm579_vm0, %v1499_v13  ;;  %670 = vmatpush1.bf16.msra.mxu0 %v1500_v15 }
  0x1c   : > { %713 = vmatpush1.bf16.msra.mxu1 %v1503_v17  ;;  %671 = vmatprep.subr.bf16.mxu0 %v1508_v18 }
  0x1d   : > { %714 = vmatprep.subr.bf16.mxu1 %v1511_v19  ;;  %701 = vmatprep.mubr.bf16.mxu0 %v1539_v0 }
  0x1e   : > { %744 = vmatprep.mubr.bf16.mxu1 %v1539_v0 }
  0x1f   : > { %672 = vmatpush1.bf16.msra.mxu0 %v1506_v20 }
  0x20   : > { %715 = vmatpush1.bf16.msra.mxu1 %v1509_v21  ;;  %755 = vmatprep.subr.bf16.mxu0 %v1514_v22 }
  0x21   : > { %1033 = vmatprep.subr.bf16.mxu1 %v1539_v0 }
  0x22   : > { %1433 = vmatmul.mubr.msk.bf16.vlgmr.msra.gmra.mrb[4].mxu0 %vm579_vm0, %v1499_v13 }
  0x23   : > { %1434 = vmatmul.mubr.msk.bf16.vlgmr.msra.gmra.mrb[4].mxu1 %vm579_vm0, %v1499_v13  ;;  %756 = vmatpush1.bf16.msra.mxu0 %v1512_v23 }
  0x24   : > { %787 = vmatprep.mubr.bf16.mxu0 %v1539_v0  ;;  %757 = vmatprep.subr.bf16.mxu0 %v1517_v24 }
  0x27   : > { %758 = vmatpush1.bf16.msra.mxu0 %v1515_v25 }
  0x28   : > { %1188 = vmatprep.subr.bf16.mxu0 %v1539_v0 }
  0x2a   : > { %1435 = vmatmul.mubr.msk.bf16.vlgmr.msra.gmra.mrb[8].mxu0 %vm579_vm0, %v1499_v13 }
  0x87   : > { %v1694_v36 = vpop.permute.xlu0 %466  ;;  %v1696_v38 = vpop.permute.xlu1 %822 }
  0x8b   : > { %v1723_v63 = vpop.permute.xlu0 %471  ;;  %v1730_v10 = vpop.permute.xlu1 %827 }
  0xed   : > { %v617_v41 = vpop.f32.mrb[0].mxu0 }
  0xee   : > { %v660_v42 = vpop.f32.mrb[0].mxu1  ;;  %v618_v47 = vadd.f32 %v617_v41, %v1694_v36  ;;  %v619_v49 = vpop.f32.mrb[1].mxu0 }
  0xef   : > { %v661_v48 = vadd.f32 %v660_v42, %v1694_v36  ;;  %v662_v50 = vpop.f32.mrb[1].mxu1  ;;  %v620_v53 = vadd.f32 %v619_v49, %v1694_v36  ;;  %v621_v55 = vpop.f32.mrb[2].mxu0 }
  0xf0   : > { %v663_v54 = vadd.f32 %v662_v50, %v1694_v36  ;;  %v664_v56 = vpop.f32.mrb[2].mxu1  ;;  %vm798_vm1 = vcmp.gt.f32.partialorder %v618_v47, 0.0  ;;  %v830_v59 = vmul.f32 %v1696_v38, %v618_v47  ;;  %v623_v61 = vpop.f32.mrb[3].mxu0  ;;  %v622_v5 = vadd.f32 %v621_v55, %v1723_v63 }
  0xf1   : > { %vm800_vm2 = vcmp.gt.f32.partialorder %v661_v48, 0.0  ;;  %v832_v60 = vmul.f32 %v1696_v38, %v661_v48  ;;  %v666_v62 = vpop.f32.mrb[3].mxu1  ;;  %vm799_vm3 = vcmp.gt.f32.partialorder %v620_v53, 0.0  ;;  %v831_v1 = vmul.f32 %v1696_v38, %v620_v53 }
  0xf2   : > { %vm801_vm4 = vcmp.gt.f32.partialorder %v663_v54, 0.0  ;;  %v833_v2 = vmul.f32 %v1696_v38, %v663_v54  ;;  %v850_v3 = vsel %vm798_vm1, %v618_v47, %v830_v59  ;;  %v665_v6 = vadd.f32 %v664_v56, %v1723_v63 }
  0xf3   : > { %v852_v4 = vsel %vm800_vm2, %v661_v48, %v832_v60  ;;  %v924_v7 = vadd.f32 %v877_v39, %v850_v3  ;;  %v851_v9 = vsel %vm799_vm3, %v620_v53, %v831_v1  ;;  %vm808_vm5 = vcmp.gt.f32.partialorder %v622_v5, 0.0 }
  0xf4   : > { %v926_v8 = vadd.f32 %v1701_v43, %v852_v4  ;;  %v925_v12 = vadd.f32 %v1703_v44, %v851_v9  ;;  %v853_v13 = vsel %vm801_vm4, %v663_v54, %v833_v2  ;;  %v840_v14 = vmul.f32 %v1730_v10, %v622_v5 }
  0xf5   : > { %vm810_vm6 = vcmp.gt.f32.partialorder %v665_v6, 0.0  ;;  %v842_v15 = vmul.f32 %v1730_v10, %v665_v6  ;;  %v624_v16 = vadd.f32 %v623_v61, %v1723_v63  ;;  %v667_v17 = vadd.f32 %v666_v62, %v1723_v63  ;;  %v703_v18 = vpop.f32.mrb[4].mxu0 }
  0xf6   : > { %v746_v19 = vpop.f32.mrb[4].mxu1  ;;  %v944_v20 = vmax.f32 %v924_v7, %v925_v12  ;;  %v860_v21 = vsel %vm808_vm5, %v622_v5, %v840_v14  ;;  %v704_v22 = vadd.f32 %v703_v18, %v1694_v36  ;;  %v705_v24 = vpop.f32.mrb[5].mxu0  ;;  %v927_v26 = vadd.f32 %v1705_v45, %v853_v13 }
  0xf7   : > { %v747_v23 = vadd.f32 %v746_v19, %v1694_v36  ;;  %v748_v25 = vpop.f32.mrb[5].mxu1  ;;  %v934_v27 = vadd.f32 %v877_v39, %v860_v21  ;;  %vm809_vm7 = vcmp.gt.f32.partialorder %v624_v16, 0.0  ;;  %v841_v28 = vmul.f32 %v1730_v10, %v624_v16  ;;  %v707_v29 = vpop.f32.mrb[6].mxu0 }
  0xf8   : > { %v750_v30 = vpop.f32.mrb[6].mxu1  ;;  %v946_v31 = vmax.f32 %v944_v20, %v926_v8  ;;  %v862_v32 = vsel %vm810_vm6, %v665_v6, %v842_v15  ;;  %vm811_vm8 = vcmp.gt.f32.partialorder %v667_v17, 0.0  ;;  %v843_v33 = vmul.f32 %v1730_v10, %v667_v17  ;;  %v709_v34 = vpop.f32.mrb[7].mxu0 }
  0xf9   : > { %v752_v35 = vpop.f32.mrb[7].mxu1  ;;  %v861_v37 = vsel %vm809_vm7, %v624_v16, %v841_v28  ;;  %vm802_vm9 = vcmp.gt.f32.partialorder %v704_v22, 0.0  ;;  %v834_v40 = vmul.f32 %v1696_v38, %v704_v22  ;;  %vm804_vm10 = vcmp.gt.f32.partialorder %v747_v23, 0.0 }
  0xfa   : > { %v948_v41 = vmax.f32 %v946_v31, %v927_v26  ;;  %v935_v39 = vadd.f32 %v1703_v44, %v861_v37  ;;  %v863_v42 = vsel %vm811_vm8, %v667_v17, %v843_v33  ;;  %v836_v47 = vmul.f32 %v1696_v38, %v747_v23 }
  0xfb   : > { %v936_v48 = vadd.f32 %v1701_v43, %v862_v32  ;;  %v854_v49 = vsel %vm802_vm9, %v704_v22, %v834_v40  ;;  %v706_v50 = vadd.f32 %v705_v24, %v1694_v36  ;;  %v749_v53 = vadd.f32 %v748_v25, %v1694_v36 }
  0xfc   : > { %v945_v54 = vmax.f32 %v934_v27, %v935_v39  ;;  %v937_v55 = vadd.f32 %v1705_v45, %v863_v42  ;;  %v928_v56 = vadd.f32 %v1707_v46, %v854_v49  ;;  %v708_v59 = vadd.f32 %v707_v29, %v1723_v63 }
  0xfd   : > { %v856_v60 = vsel %vm804_vm10, %v747_v23, %v836_v47  ;;  %vm803_vm11 = vcmp.gt.f32.partialorder %v706_v50, 0.0  ;;  %v835_v44 = vmul.f32 %v1696_v38, %v706_v50  ;;  %vm805_vm12 = vcmp.gt.f32.partialorder %v749_v53, 0.0  ;;  %v789_v61 = vpop.f32.mrb[8].mxu0 }
  0xfe   : > { %v947_v62 = vmax.f32 %v945_v54, %v936_v48  ;;  %v950_v43 = vmax.f32 %v948_v41, %v928_v56  ;;  %v837_v1 = vmul.f32 %v1696_v38, %v749_v53  ;;  %vm812_vm13 = vcmp.gt.f32.partialorder %v708_v59, 0.0  ;;  %v791_v2 = vpop.f32.mrb[9].mxu0  ;;  %v1076_v56 = vld [vmem:[%s1919_s7] sm:$0xff] }
  0xff   : > { %v855_v3 = vsel %vm803_vm11, %v706_v50, %v835_v44  ;;  %v844_v4 = vmul.f32 %v1730_v10, %v708_v59  ;;  %v751_v45 = vadd.f32 %v750_v30, %v1723_v63  ;;  %v710_v5 = vadd.f32 %v709_v34, %v1723_v63  ;;  %v793_v6 = vpop.f32.mrb[10].mxu0 }
 0x100   : > { %v949_v7 = vmax.f32 %v947_v62, %v937_v55  ;;  %v930_v8 = vadd.f32 %v1711_v51, %v856_v60  ;;  %v929_v9 = vadd.f32 %v1713_v52, %v855_v3  ;;  %v753_v12 = vadd.f32 %v752_v35, %v1723_v63  ;;  %v795_v13 = vpop.f32.mrb[11].mxu0 }
 0x101   : > { %v857_v14 = vsel %vm805_vm12, %v749_v53, %v837_v1  ;;  %v864_v15 = vsel %vm812_vm13, %v708_v59, %v844_v4  ;;  %vm814_vm14 = vcmp.gt.f32.partialorder %v751_v45, 0.0  ;;  %v846_v16 = vmul.f32 %v1730_v10, %v751_v45  ;;  %v1518_v59 = vld [vmem:[%s1917_s5 + $0x4] ss:$8 sps:$4 sm:$0xff]  }
 0x102   : > { %v952_v17 = vmax.f32 %v950_v43, %v929_v9  ;;  %v938_v18 = vadd.f32 %v1707_v46, %v864_v15  ;;  %vm813_vm15 = vcmp.gt.f32.partialorder %v710_v5, 0.0  ;;  %v845_v19 = vmul.f32 %v1730_v10, %v710_v5  ;;  %v1520_v9 = vld [vmem:[%s1917_s5] ss:$8 sps:$4 sm:$0xff]  }
 0x103   : > { %v866_v20 = vsel %vm814_vm14, %v751_v45, %v846_v16  ;;  %vm815_vm1 = vcmp.gt.f32.partialorder %v753_v12, 0.0  ;;  %v847_v21 = vmul.f32 %v1730_v10, %v753_v12  ;;  %v790_v22 = vadd.f32 %v789_v61, %v1694_v36 }
 0x104   : > { %v931_v23 = vadd.f32 %v1717_v57, %v857_v14  ;;  %v954_v24 = vmax.f32 %v952_v17, %v930_v8  ;;  %v951_v25 = vmax.f32 %v949_v7, %v938_v18  ;;  %v865_v26 = vsel %vm813_vm15, %v710_v5, %v845_v19 }
 0x105   : > { %v939_v27 = vadd.f32 %v1713_v52, %v865_v26  ;;  %v867_v28 = vsel %vm815_vm1, %v753_v12, %v847_v21  ;;  %vm806_vm2 = vcmp.gt.f32.partialorder %v790_v22, 0.0  ;;  %v838_v46 = vmul.f32 %v1696_v38, %v790_v22 }
 0x106   : > { %v956_v29 = vmax.f32 %v954_v24, %v931_v23  ;;  %v940_v30 = vadd.f32 %v1711_v51, %v866_v20  ;;  %v792_v31 = vadd.f32 %v791_v2, %v1694_v36  ;;  %v794_v32 = vadd.f32 %v793_v6, %v1723_v63 }
 0x107   : > { %v953_v33 = vmax.f32 %v951_v25, %v939_v27  ;;  %v941_v34 = vadd.f32 %v1717_v57, %v867_v28  ;;  %v858_v35 = vsel %vm806_vm2, %v790_v22, %v838_v46  ;;  %v796_v37 = vadd.f32 %v795_v13, %v1723_v63  ;;  %v1141_v27 = vld [vmem:[%s1921_s9 + $0x8] sm:$0xff]  ;;  %v1140_v28 = vld [vmem:[%s1921_s9] sm:$0xff] }
 0x108   : > { %v932_v40 = vadd.f32 %v1719_v58, %v858_v35  ;;  %vm807_vm3 = vcmp.gt.f32.partialorder %v792_v31, 0.0  ;;  %v839_v52 = vmul.f32 %v1696_v38, %v792_v31  ;;  %vm816_vm4 = vcmp.gt.f32.partialorder %v794_v32, 0.0  ;;  %v1242_v46 = vld [vmem:[%s1922_s10 + $0x8] sm:$0xff]  ;;  %v1276_v35 = vld [vmem:[%s1924_s12] sm:$0xff] }
 0x109   : > { %v955_v41 = vmax.f32 %v953_v33, %v940_v30  ;;  %v848_v39 = vmul.f32 %v1730_v10, %v794_v32  ;;  %vm817_vm5 = vcmp.gt.f32.partialorder %v796_v37, 0.0  ;;  %v849_v36 = vmul.f32 %v1730_v10, %v796_v37  ;;  %v1008_v10 = vld [vmem:[%s1918_s6] sm:$0xff]  ;;  %v1143_v30 = vld [vmem:[%s1921_s9 + $0x18] sm:$0xff]  ;;  %v1243_v33 = vld [vmem:[%s1922_s10 + $0x10] sm:$0xff] }
 0x10a   : > { %v958_v51 = vmax.f32 %v956_v29, %v932_v40  ;;  %v859_v42 = vsel %vm807_vm3, %v792_v31, %v839_v52  ;;  %vm1029_vm6 = vcmask 916480   ;;  %v1241_v29 = vld [vmem:[%s1922_s10] sm:$0xff]  ;;  %v1142_v31 = vld [vmem:[%s1921_s9 + $0x10] sm:$0xff]  ;;  %vm1555_vm9 = vmmov 0  }
 0x10b   : > { %v957_v47 = vmax.f32 %v955_v41, %v941_v34  ;;  %v933_v57 = vadd.f32 %v1732_v11, %v859_v42  ;;  %v868_v48 = vsel %vm816_vm4, %v794_v32, %v848_v39  ;;  %v869_v49 = vsel %vm817_vm5, %v796_v37, %v849_v36  ;;  %1438 = vmatprep.mubr.msk.bf16.mxu1 %vm1029_vm6, %v1518_v59  ;;  %v1244_v32 = vld [vmem:[%s1922_s10 + $0x18] sm:$0xff]  ;;  %v1521_v34 = vld [vmem:[%s1920_s8 + $0x4] ss:$8 sps:$4 sm:$0xff]  }
 0x10c   : > { %v942_v63 = vadd.f32 %v1719_v58, %v868_v48  ;;  %v943_v50 = vadd.f32 %v1732_v11, %v869_v49  ;;  %v1009_v58 = vld [vmem:[%s1918_s6 + $0x8] sm:$0xff]  ;;  %1443 = vmatprep.mubr.msk.bf16.mxu0 %vm1029_vm6, %v1521_v34  ;;  %vm1325_vm14 = vcmask 648192   ;;  %vm1347_vm15 = vcmask 654336  }
 0x10d   : > { %v960_v53 = vmax.f32 %v958_v51, %v933_v57  ;;  %v1077_v11 = vld [vmem:[%s1919_s7 + $0x8] sm:$0xff] }
 0x10e   : > { %v959_v38 = vmax.f32 %v957_v47, %v942_v63 }
 0x110   : > { %v961_v54 = vmax.f32 %v959_v38, %v943_v50  ;;  %v1524_v38 = vld [vmem:[%s1920_s8 + $0x14] ss:$8 sps:$4 sm:$0xff]  }
 0x112   : > { %v962_v55 = vpack.c.bf16 %v961_v54, %v960_v53  ;;  %v1523_v53 = vld [vmem:[%s1920_s8] ss:$8 sps:$4 sm:$0xff]   ;;  %v1526_v54 = vld [vmem:[%s1920_s8 + $0x10] ss:$8 sps:$4 sm:$0xff]  }
 0x114   : > { %967 = vrot.lane.b32.xlu1 %v962_v55, %s1540_s30  ;;  %964 = vrot.lane.b32.xlu0 %v962_v55, %s1541_s14 }
 0x115   : > { %1034 = vmatpush1.bf16.msra.mxu1 %v962_v55 }
 0x116   : > { %1035 = vmatprep.subr.bf16.mxu1 %v1539_v0 }
 0x118   : > { %973 = vrot.lane.b32.xlu1 %v962_v55, %s1542_s15  ;;  %970 = vrot.lane.b32.xlu0 %v962_v55, %s1543_s16 }
 0x11c   : > { %979 = vrot.lane.b32.xlu1 %v962_v55, %s1544_s17  ;;  %976 = vrot.lane.b32.xlu0 %v962_v55, %s1932_s18 }
 0x120   : > { %985 = vrot.lane.b32.xlu1 %v962_v55, %s1928_s19  ;;  %982 = vrot.lane.b32.xlu0 %v962_v55, %s1926_s20  ;;  %s1935_s20 = smov 118  }
 0x124   : > { %991 = vrot.lane.b32.xlu1 %v962_v55, %s1927_s21  ;;  %988 = vrot.lane.b32.xlu0 %v962_v55, %s1930_s22  ;;  %s1936_s21 = smov 115   ;;  %s1937_s22 = smov 116  }
 0x128   : > { %997 = vrot.lane.b32.xlu1 %v962_v55, %s1929_s23  ;;  %994 = vrot.lane.b32.xlu0 %v962_v55, %s1931_s24  ;;  %s1938_s23 = smov 108   ;;  %s1941_s24 = smov 107  }
 0x12c   : > { %1003 = vrot.lane.b32.xlu1 %v962_v55, %s1934_s27  ;;  %1000 = vrot.lane.b32.xlu0 %v962_v55, %s1933_s28  ;;  %s1942_s27 = smov 104   ;;  %v1554_v55 = vmov 0.0  }
 0x130   : > { %1017 = vperm.xlu1 %1486, %v1009_v58   ;;  %1012 = vperm.xlu0 %1485, %v1008_v10  }
 0x134   : > { %1085 = vperm.xlu1 %1486, %v1077_v11   ;;  %1080 = vperm.xlu0 %1485, %v1076_v56  }
 0x186   : > { %v965_v60 = vpop.permute.xlu0 %964  ;;  %v968_v44 = vpop.permute.xlu1 %967 }
 0x187   : > { %1036 = vmatpush1.bf16.msra.mxu1 %v965_v60 }
 0x188   : > { %1037 = vmatprep.subr.bf16.mxu1 %v1539_v0 }
 0x18a   : > { %v971_v61 = vpop.permute.xlu0 %970  ;;  %v974_v62 = vpop.permute.xlu1 %973 }
 0x18b   : > { %1038 = vmatpush1.bf16.msra.mxu1 %v968_v44 }
 0x18c   : > { %1039 = vmatprep.subr.bf16.mxu1 %v1539_v0 }
 0x18e   : > { %v977_v43 = vpop.permute.xlu0 %976  ;;  %v980_v1 = vpop.permute.xlu1 %979 }
 0x18f   : > { %1040 = vmatpush1.bf16.msra.mxu1 %v971_v61 }
 0x190   : > { %1041 = vmatprep.subr.bf16.mxu1 %v1539_v0 }
 0x192   : > { %v983_v2 = vpop.permute.xlu0 %982  ;;  %v986_v3 = vpop.permute.xlu1 %985 }
 0x193   : > { %1042 = vmatpush1.bf16.msra.mxu1 %v974_v62 }
 0x194   : > { %1043 = vmatprep.subr.bf16.mxu1 %v1539_v0 }
 0x196   : > { %v989_v4 = vpop.permute.xlu0 %988  ;;  %v992_v45 = vpop.permute.xlu1 %991 }
 0x197   : > { %1044 = vmatpush1.bf16.msra.mxu1 %v977_v43 }
 0x198   : > { %1045 = vmatprep.subr.bf16.mxu1 %v1539_v0 }
 0x19a   : > { %v995_v5 = vpop.permute.xlu0 %994  ;;  %v998_v6 = vpop.permute.xlu1 %997 }
 0x19b   : > { %1046 = vmatpush1.bf16.msra.mxu1 %v980_v1 }
 0x19c   : > { %1047 = vmatprep.subr.bf16.mxu1 %v1539_v0 }
 0x19e   : > { %v1001_v7 = vpop.permute.xlu0 %1000  ;;  %v1004_v8 = vpop.permute.xlu1 %1003 }
 0x19f   : > { %1048 = vmatpush1.bf16.msra.mxu1 %v983_v2 }
 0x1a0   : > { %1049 = vmatprep.subr.bf16.mxu1 %v1539_v0 }
 0x1a3   : > { %1050 = vmatpush1.bf16.msra.mxu1 %v986_v3 }
 0x1a4   : > { %1051 = vmatprep.subr.bf16.mxu1 %v1539_v0 }
 0x1a7   : > { %1052 = vmatpush1.bf16.msra.mxu1 %v989_v4 }
 0x1a8   : > { %1053 = vmatprep.subr.bf16.mxu1 %v1539_v0 }
 0x1ab   : > { %1054 = vmatpush1.bf16.msra.mxu1 %v992_v45 }
 0x1ac   : > { %1055 = vmatprep.subr.bf16.mxu1 %v1539_v0 }
 0x1af   : > { %1056 = vmatpush1.bf16.msra.mxu1 %v995_v5  ;;  %v1013_v12 = vpop.permute.xlu0 %1012  ;;  %v1018_v13 = vpop.permute.xlu1 %1017 }
 0x1b0   : > { %1057 = vmatprep.subr.bf16.mxu1 %v1539_v0 }
 0x1b3   : > { %1058 = vmatpush1.bf16.msra.mxu1 %v998_v6  ;;  %v1081_v17 = vpop.permute.xlu0 %1080  ;;  %v1086_v22 = vpop.permute.xlu1 %1085 }
 0x1b4   : > { %1059 = vmatprep.subr.bf16.mxu1 %v1539_v0 }
 0x1b7   : > { %1060 = vmatpush1.bf16.msra.mxu1 %v1001_v7 }
 0x1b8   : > { %1061 = vmatprep.subr.bf16.mxu1 %v1539_v0 }
 0x1bb   : > { %1062 = vmatpush1.bf16.msra.mxu1 %v1004_v8 }
 0x1bc   : > { %1451 = vmatprep.subr.bf16.mxu1 %v1554_v55 }
 0x1be   : > { %1066 = vmatmul.mubr.bf16.vlgmr.msra.gmra.mrb[8].mxu1 %v1520_v9 }
 0x1bf   : > { %1455 = vmatprep.mubr.msk.bf16.mxu1 %vm1555_vm9, %v1554_v55 }
 0x291   : > { %v1067_v14 = vpop.f32.mrb[8].mxu1 }
 0x292   : > { %v1068_v15 = vadd.f32 %v1067_v14, %v1013_v12  ;;  %v1069_v16 = vpop.f32.mrb[9].mxu1 }
 0x293   : > { %v1070_v18 = vpop.f32.mrb[10].mxu1 }
 0x294   : > { %v1088_v19 = vmul.f32 %v1081_v17, %v1068_v15  ;;  %v1071_v20 = vadd.f32 %v1070_v18, %v1018_v13  ;;  %v1072_v21 = vpop.f32.mrb[11].mxu1  ;;  %vm1074_vm7 = vcmp.gt.f32.partialorder %v1068_v15, 0.0 }
 0x295   : > { %v1275_v21 = vld [vmem:[%s1923_s11] sm:$0xf] }
 0x296   : > { %vm1075_vm8 = vcmp.gt.f32.partialorder %v1071_v20, 0.0  ;;  %v1089_v23 = vmul.f32 %v1086_v22, %v1071_v20  ;;  %v1090_v24 = vsel %vm1074_vm7, %v1068_v15, %v1088_v19 }
 0x298   : > { %v1091_v25 = vsel %vm1075_vm8, %v1071_v20, %v1089_v23 }
 0x299   : > { %v1092_v26 = vpack.c.bf16 %v1091_v25, %v1090_v24 }
 0x29b   : > { %1097 = vrot.lane.b32.xlu1 %v1092_v26, %s1540_s30  ;;  %1094 = vrot.lane.b32.xlu0 %v1092_v26, %s1541_s14  ;;  %s1939_s30 = smov 114   ;;  %s1940_s14 = smov 106  }
 0x29c   : > { %1189 = vmatpush1.bf16.msra.mxu0 %v1092_v26 }
 0x29d   : > { %1190 = vmatprep.subr.bf16.mxu0 %v1539_v0 }
 0x29f   : > { %1103 = vrot.lane.b32.xlu1 %v1092_v26, %s1542_s15  ;;  %1100 = vrot.lane.b32.xlu0 %v1092_v26, %s1543_s16  ;;  %s1943_s15 = smov 105  }
 0x2a3   : > { %1109 = vrot.lane.b32.xlu1 %v1092_v26, %s1544_s17  ;;  %1106 = vrot.lane.b32.xlu0 %v1092_v26, %s1935_s20 }
 0x2a7   : > { %1115 = vrot.lane.b32.xlu1 %v1092_v26, %s1936_s21  ;;  %1112 = vrot.lane.b32.xlu0 %v1092_v26, %s1937_s22 }
 0x2ab   : > { %1121 = vrot.lane.b32.xlu1 %v1092_v26, %s1938_s23  ;;  %1118 = vrot.lane.b32.xlu0 %v1092_v26, %s1939_s30 }
 0x2af   : > { %1127 = vrot.lane.b32.xlu1 %v1092_v26, %s1940_s14  ;;  %1124 = vrot.lane.b32.xlu0 %v1092_v26, %s1941_s24 }
 0x2b3   : > { %1133 = vrot.lane.b32.xlu1 %v1092_v26, %s1942_s27  ;;  %1130 = vrot.lane.b32.xlu0 %v1092_v26, %s1943_s15  ;;  %s1409_s27 = sshll.u32 %s1945_s26, 3 }
 0x2b4   : > { %s438_s17 = scalar_lea.vmem %s1925_s13, %s1409_s27 }
 0x2b7   : > { %1151 = vperm.xlu1 %1486, %v1141_v27   ;;  %1146 = vperm.xlu0 %1485, %v1140_v28  }
 0x2bb   : > { %1252 = vperm.xlu1 %1486, %v1242_v46   ;;  %1247 = vperm.xlu0 %1485, %v1241_v29  }
 0x2bf   : > { %1161 = vperm.xlu1 %1486, %v1143_v30   ;;  %1156 = vperm.xlu0 %1485, %v1142_v31  }
 0x2c3   : > { %1262 = vperm.xlu1 %1486, %v1244_v32   ;;  %1257 = vperm.xlu0 %1485, %v1243_v33  }
 0x2c7   : > { %1279 = vperm.xlu0 %1485, %v1276_v35  }
 0x30d   : > { %v1095_v37 = vpop.permute.xlu0 %1094  ;;  %v1098_v40 = vpop.permute.xlu1 %1097 }
 0x30e   : > { %1191 = vmatpush1.bf16.msra.mxu0 %v1095_v37 }
 0x30f   : > { %1192 = vmatprep.subr.bf16.mxu0 %v1539_v0 }
 0x311   : > { %v1101_v52 = vpop.permute.xlu0 %1100  ;;  %v1104_v41 = vpop.permute.xlu1 %1103 }
 0x312   : > { %1193 = vmatpush1.bf16.msra.mxu0 %v1098_v40 }
 0x313   : > { %1194 = vmatprep.subr.bf16.mxu0 %v1539_v0 }
 0x315   : > { %v1107_v39 = vpop.permute.xlu0 %1106  ;;  %v1110_v36 = vpop.permute.xlu1 %1109 }
 0x316   : > { %1195 = vmatpush1.bf16.msra.mxu0 %v1101_v52 }
 0x317   : > { %1196 = vmatprep.subr.bf16.mxu0 %v1539_v0 }
 0x319   : > { %v1113_v51 = vpop.permute.xlu0 %1112  ;;  %v1116_v42 = vpop.permute.xlu1 %1115 }
 0x31a   : > { %1197 = vmatpush1.bf16.msra.mxu0 %v1104_v41 }
 0x31b   : > { %1198 = vmatprep.subr.bf16.mxu0 %v1539_v0 }
 0x31d   : > { %v1119_v47 = vpop.permute.xlu0 %1118  ;;  %v1122_v57 = vpop.permute.xlu1 %1121 }
 0x31e   : > { %1199 = vmatpush1.bf16.msra.mxu0 %v1107_v39 }
 0x31f   : > { %1200 = vmatprep.subr.bf16.mxu0 %v1539_v0 }
 0x321   : > { %v1125_v48 = vpop.permute.xlu0 %1124  ;;  %v1128_v49 = vpop.permute.xlu1 %1127 }
 0x322   : > { %1201 = vmatpush1.bf16.msra.mxu0 %v1110_v36 }
 0x323   : > { %1202 = vmatprep.subr.bf16.mxu0 %v1539_v0 }
 0x325   : > { %v1131_v63 = vpop.permute.xlu0 %1130  ;;  %v1134_v50 = vpop.permute.xlu1 %1133 }
 0x326   : > { %1203 = vmatpush1.bf16.msra.mxu0 %v1113_v51 }
 0x327   : > { %1204 = vmatprep.subr.bf16.mxu0 %v1539_v0 }
 0x32a   : > { %1205 = vmatpush1.bf16.msra.mxu0 %v1116_v42 }
 0x32b   : > { %1206 = vmatprep.subr.bf16.mxu0 %v1539_v0 }
 0x32e   : > { %1207 = vmatpush1.bf16.msra.mxu0 %v1119_v47 }
 0x32f   : > { %1208 = vmatprep.subr.bf16.mxu0 %v1539_v0 }
 0x332   : > { %1209 = vmatpush1.bf16.msra.mxu0 %v1122_v57 }
 0x333   : > { %1210 = vmatprep.subr.bf16.mxu0 %v1539_v0 }
 0x336   : > { %1211 = vmatpush1.bf16.msra.mxu0 %v1125_v48  ;;  %v1152_v58 = vpop.permute.xlu1 %1151 }
 0x337   : > { %1212 = vmatprep.subr.bf16.mxu0 %v1539_v0 }
 0x33a   : > { %1213 = vmatpush1.bf16.msra.mxu0 %v1128_v49  ;;  %v1253_v11 = vpop.permute.xlu1 %1252 }
 0x33b   : > { %1214 = vmatprep.subr.bf16.mxu0 %v1539_v0 }
 0x33e   : > { %1215 = vmatpush1.bf16.msra.mxu0 %v1131_v63  ;;  %v1162_v3 = vpop.permute.xlu1 %1161 }
 0x33f   : > { %1216 = vmatprep.subr.bf16.mxu0 %v1539_v0  ;;  %v1147_v0 = vpop.permute.xlu0 %1146 }
 0x342   : > { %1217 = vmatpush1.bf16.msra.mxu0 %v1134_v50  ;;  %v1263_v16 = vpop.permute.xlu1 %1262 }
 0x343   : > { %v1248_v10 = vpop.permute.xlu0 %1247 }
 0x345   : > { %1221 = vmatmul.mubr.bf16.vlgmr.msra.gmra.mrb[12].mxu0 %v1523_v53 }
 0x346   : > { %1444 = vmatprep.mubr.msk.bf16.mxu0 %vm1029_vm6, %v1524_v38 }
 0x347   : > { %v1157_v1 = vpop.permute.xlu0 %1156 }
 0x34b   : > { %v1258_v9 = vpop.permute.xlu0 %1257 }
 0x34d   : > { %1229 = vmatmul.mubr.bf16.gmra.mrb[16].mxu0 %v1526_v54 }
 0x34f   : > { %v1280_v22 = vpop.permute.xlu0 %1279 }
 0x418   : > { %v1222_v56 = vpop.f32.mrb[12].mxu0 }
 0x419   : > { %v1223_v59 = vadd.f32 %v1222_v56, %v1147_v0  ;;  %v1224_v60 = vpop.f32.mrb[13].mxu0 }
 0x41a   : > { %v1225_v44 = vpop.f32.mrb[14].mxu0 }
 0x41b   : > { %v1265_v61 = vmul.f32 %v1248_v10, %v1223_v59  ;;  %v1226_v62 = vadd.f32 %v1225_v44, %v1152_v58  ;;  %v1227_v43 = vpop.f32.mrb[15].mxu0  ;;  %vm1237_vm10 = vcmp.gt.f32.partialorder %v1223_v59, 0.0 }
 0x41d   : > { %vm1238_vm11 = vcmp.gt.f32.partialorder %v1226_v62, 0.0  ;;  %v1266_v2 = vmul.f32 %v1253_v11, %v1226_v62  ;;  %v1269_v4 = vsel %vm1237_vm10, %v1223_v59, %v1265_v61 }
 0x41f   : > { %v1270_v45 = vsel %vm1238_vm11, %v1226_v62, %v1266_v2 }
 0x420   : > { %v1273_v5 = vpack.c.bf16 %v1270_v45, %v1269_v4  ;;  %v1230_v6 = vpop.f32.mrb[16].mxu0 }
 0x421   : > { %v1231_v7 = vadd.f32 %v1230_v6, %v1157_v1  ;;  %v1232_v8 = vpop.f32.mrb[17].mxu0 }
 0x422   : > { %v1233_v12 = vpop.f32.mrb[18].mxu0  ;;  %1452 = vmatpush3.bf16.msra.mxu1 %v1273_v5 }
 0x423   : > { %v1267_v13 = vmul.f32 %v1258_v9, %v1231_v7  ;;  %v1234_v14 = vadd.f32 %v1233_v12, %v1162_v3  ;;  %v1235_v15 = vpop.f32.mrb[19].mxu0  ;;  %1453 = vmatprep.subr.bf16.mxu1 %v1554_v55  ;;  %vm1239_vm12 = vcmp.gt.f32.partialorder %v1231_v7, 0.0 }
 0x425   : > { %vm1240_vm13 = vcmp.gt.f32.partialorder %v1234_v14, 0.0  ;;  %v1268_v17 = vmul.f32 %v1263_v16, %v1234_v14  ;;  %v1271_v18 = vsel %vm1239_vm12, %v1231_v7, %v1267_v13 }
 0x427   : > { %v1272_v19 = vsel %vm1240_vm13, %v1234_v14, %v1268_v17 }
 0x428   : > { %v1274_v20 = vpack.c.bf16 %v1272_v19, %v1271_v18 }
 0x42a   : > { %1454 = vmatpush3.bf16.msra.mxu1 %v1274_v20 }
 0x42d   : > { %1456 = vmatmul.mubr.msk.bf16.vlgmr.msra.gmra.mrb[12].mxu1 %vm579_vm0, %v1275_v21  ;;  %vm1345_vm0 = vcmask 1041408  }
 0x500   : > { %v1319_v23 = vpop.f32.mrb[12].mxu1 }
 0x501   : > { %v1320_v24 = vadd.f32 %v1319_v23, %v1280_v22  ;;  %v1457_v25 = vpop.f32.mrb[13].mxu1 }
 0x502   : > { %v1322_v26 = vpop.f32.mrb[14].mxu1 }
 0x503   : > { %v1326_v27 = vsel %vm1325_vm14, %v1320_v24, -inf  ;;  %v1458_v28 = vpop.f32.mrb[15].mxu1 }
 0x504   : > { %v1327_v46 = vrot.slane %v1326_v27, 4 }
 0x506   : > { %v1328_v29 = vmax.f32 %v1326_v27, %v1327_v46 }
 0x508   : > { %v1329_v30 = vrot.slane %v1328_v29, 2 }
 0x50a   : > { %v1330_v31 = vmax.f32 %v1328_v29, %v1329_v30 }
 0x50c   : > { %v1331_v32 = vrot.slane %v1330_v31, 1 }
 0x50e   : > { %v1332_v33 = vmax.f32 %v1330_v31, %v1331_v32 }
 0x510   : > { %v1333_v34 = vsub.f32 %v1320_v24, %v1332_v33 }
 0x512   : > { %v1334_v35 = vmul.f32 1.442695, %v1333_v34 }
 0x514   : > { %1527 = vpow2.f32 %v1334_v35 }
 0x51e   : > { %v1528_v37 = vpop.eup %1527 }
 0x51f   : > { %v1336_v40 = vsel %vm1325_vm14, %v1528_v37, 0.0 }
 0x520   : > { %v1337_v52 = vrot.slane %v1336_v40, 4 }
 0x522   : > { %v1338_v41 = vadd.f32 %v1337_v52, %v1336_v40 }
 0x524   : > { %v1339_v39 = vrot.slane %v1338_v41, 2 }
 0x526   : > { %v1340_v36 = vadd.f32 %v1339_v39, %v1338_v41 }
 0x528   : > { %v1341_v51 = vrot.slane %v1340_v36, 1 }
 0x52a   : > { %v1342_v42 = vadd.f32 %v1341_v51, %v1340_v36 }
 0x52c   : > { %1529 = vrcp.f32 %v1342_v42 }
 0x536   : > { %v1530_v47 = vpop.eup %1529 }
 0x537   : > { %v1344_v57 = vmul.f32 %v1530_v47, %v1528_v37 }
 0x539   : > { %v1346_v48 = vsel %vm1345_vm0, %v1344_v57, %v1320_v24 }
 0x53a   : > { %v1348_v49 = vsel %vm1347_vm15, %v1346_v48, 0.0 }
 0x53b   : > { %1349 = vst [vmem:[%s438_s17] sm:$0xff] %v1348_v49 }
 0x53c PF: > { %s23_s25 = sadd.s32 1, %s1537_s25  }
 0x53d   : > { %p20_p4 = scmp.ge.s32.totalorder %s23_s25, 4  }
 0x53f   :  { %22 = sbr.rel (!%p20_p4) target bundleno = 1 (0x1), region = 102 }

</bundles_post_ra>
